<compile_context>
chip_gen: v6e
topology: v6e:2x2x1
jax: 0.10.0
libtpu: 0.0.40
codegen_flags: <defaults>
</compile_context>

<pallas_src>
import numpy as np
import jax
import jax.numpy as jnp
from jax import lax
from jax.experimental import pallas as pl
from jax.experimental.pallas import tpu as pltpu


# ----------------- anchor precomputation (init-time glue, numpy) -----------------
def _whctrs_np(anchor):
    w = anchor[2] - anchor[0] + 1
    h = anchor[3] - anchor[1] + 1
    x_ctr = anchor[0] + 0.5 * (w - 1)
    y_ctr = anchor[1] + 0.5 * (h - 1)
    return w, h, x_ctr, y_ctr


def _mkanchors_np(ws, hs, x_ctr, y_ctr):
    ws = ws[:, np.newaxis]
    hs = hs[:, np.newaxis]
    return np.hstack((x_ctr - 0.5 * (ws - 1),
                      y_ctr - 0.5 * (hs - 1),
                      x_ctr + 0.5 * (ws - 1),
                      y_ctr + 0.5 * (hs - 1)))


def _ratio_enum_np(anchor, ratios):
    w, h, x_ctr, y_ctr = _whctrs_np(anchor)
    size = w * h
    size_ratios = size / ratios
    ws = np.round(np.sqrt(size_ratios))
    hs = np.round(ws * ratios)
    return _mkanchors_np(ws, hs, x_ctr, y_ctr), x_ctr, y_ctr


def _scale_enum_np(anchor, scales):
    w, h, x_ctr, y_ctr = _whctrs_np(anchor)
    ws = w * scales
    hs = h * scales
    return _mkanchors_np(ws, hs, x_ctr, y_ctr)


def generate_anchors_np(stride=16, sizes=(32, 64, 128, 256, 512),
                        aspect_ratios=(0.5, 1, 2)):
    scales = np.array(sizes, dtype=np.float64) / stride
    ratios = np.array(aspect_ratios, dtype=np.float64)
    base_anchor = np.array([1, 1, stride, stride], dtype=np.float64) - 1
    anchors, x_ctr, y_ctr = _ratio_enum_np(base_anchor, ratios)
    anchors = np.vstack([_scale_enum_np(anchors[i, :], scales)
                         for i in range(anchors.shape[0])])
    return anchors, x_ctr, y_ctr


# ------------------------------- Pallas kernel -----------------------------------
def _make_kernel(base_x_ctr, base_y_ctr, straddle_thresh, c_pad):
    """Kernel with module constants (base center, straddle_thresh) baked in.

    Layouts (images in lanes, anchor*4 + coord in sublanes):
      img_ref : (8, rb)      rows = [x1, y1, x2, y2, W, H, 0, 0]
      base_ref: (c_pad, 1)   row r = anchor*4 + coord value of the cell anchor
      out_ref : (c_pad, rb)  shifted + visibility-clamped anchors
    """
    base_x = float(base_x_ctr)
    base_y = float(base_y_ctr)
    thr = float(straddle_thresh)

    def kernel(img_ref, base_ref, out_ref):
        x1 = img_ref[0:1, :]
        y1 = img_ref[1:2, :]
        x2 = img_ref[2:3, :]
        y2 = img_ref[3:4, :]
        img_w = img_ref[4:5, :]
        img_h = img_ref[5:6, :]

        # _whctrs on each target bbox -> per-image shifts, (1, rb) row vectors
        w = x2 - x1 + 1.0
        h = y2 - y1 + 1.0
        shift_x = (x1 + 0.5 * (w - 1.0)) - base_x
        shift_y = (y1 + 0.5 * (h - 1.0)) - base_y

        rb = out_ref.shape[1]
        # row r = anchor*4 + coord; coord = r & 3
        row = lax.broadcasted_iota(jnp.int32, (c_pad, rb), 0)
        is_x = (row & 1) == 0        # coord in {x1, x2}
        is_low = (row & 2) == 0      # coord in {x1, y1}

        shift = jnp.where(is_x, shift_x, shift_y)          # (c_pad, rb)
        v = base_ref[...] + shift                          # lane-bcast (c_pad,1)

        bound = jnp.where(is_x, img_w, img_h)              # (c_pad, rb)

        # remove_visibility
        if thr == 0.0:
            # where(v <  0, 0, v)  == max(v, 0)
            # where(v >= B, B, v)  == min(v, B)
            v = jnp.where(is_low, jnp.maximum(v, 0.0), jnp.minimum(v, bound))
        else:
            # NOTE: reference semantics set out-of-range low values to +thr,
            # which is NOT a clamp against -thr; keep compare+select.
            hi = bound + thr
            v = jnp.where(is_low,
                          jnp.where(v < -thr, thr, v),
                          jnp.where(v >= hi, hi, v))

        out_ref[...] = v

    return kernel


def anchor_generator_forward(bboxes, image_sizes, base_anchors_np,
                             base_x_ctr, base_y_ctr, straddle_thresh=0.0,
                             row_block=1024):
    """
    bboxes:          (N, 4) f32 -- one target bbox per image (x1, y1, x2, y2)
    image_sizes:     (N, 2) f32 -- (width, height) per image
    base_anchors_np: (A, 4) numpy -- cell anchors from generate_anchors (init-time)
    returns:         (C_pad, N_pad) f32 planes where row r = anchor*4 + coord
                     (lane-dense padded layout; use planes_to_boxes() to get the
                     PyTorch (N, A, 4) layout on the host).
    """
    N = int(bboxes.shape[0])
    A = int(base_anchors_np.shape[0])
    C = 4 * A
    C_pad = ((C + 7) // 8) * 8                       # 36 -> 40 sublanes

    # init-time (host/numpy) base-anchor column, row = anchor*4 + coord
    base_col = np.zeros((C_pad, 1), dtype=np.float32)
    base_col[:C, 0] = np.asarray(base_anchors_np, dtype=np.float32).reshape(-1)
    base_t = jnp.asarray(base_col)

    # images live in the lane dim -> row block is a multiple of 128
    n_pad_min = ((N + 127) // 128) * 128
    rb = max(128, min((int(row_block) // 128) * 128, n_pad_min))
    N_pad = ((N + rb - 1) // rb) * rb

    # fused per-image input, transposed to (8, N_pad): rows [x1,y1,x2,y2,W,H,0,0]
    img = jnp.concatenate(
        [bboxes.astype(jnp.float32), image_sizes.astype(jnp.float32)],
        axis=1).T                                    # (6, N)
    img = jnp.pad(img, ((0, 2), (0, N_pad - N)))     # (8, N_pad)

    kernel = _make_kernel(base_x_ctr, base_y_ctr, straddle_thresh, C_pad)

    planes = pl.pallas_call(
        kernel,
        out_shape=jax.ShapeDtypeStruct((C_pad, N_pad), jnp.float32),
        grid=(N_pad // rb,),
        in_specs=[
            pl.BlockSpec((8, rb), lambda i: (0, i)),       # fused per-image data
            pl.BlockSpec((C_pad, 1), lambda i: (0, 0)),    # base anchor column
        ],
        out_specs=pl.BlockSpec((C_pad, rb), lambda i: (0, i)),
        compiler_params=pltpu.CompilerParams(
            dimension_semantics=("parallel",)),
    )(img, base_t)

    # No device-side compaction slice: return the padded planes; host helper
    # below does the un-padding + (N, A, 4) re-layout.
    return planes


def planes_to_boxes(planes, num_images, num_anchors):
    """Host-side un-pad + re-layout (C_pad, N_pad) -> (N, A, 4) (PyTorch layout)."""
    arr = np.asarray(planes)[: 4 * num_anchors, :num_images]   # (4A, N)
    return arr.reshape(num_anchors, 4, num_images).transpose(2, 0, 1)


# --------------------------- numpy reference (for checks) ------------------------
def _reference_np(bboxes, image_sizes, base_anchors_np, base_x_ctr, base_y_ctr,
                  straddle_thresh):
    bb = np.asarray(bboxes, dtype=np.float64)
    szs = np.asarray(image_sizes, dtype=np.float64)
    out = []
    for n in range(bb.shape[0]):
        w = bb[n, 2] - bb[n, 0] + 1
        h = bb[n, 3] - bb[n, 1] + 1
        x_ctr = bb[n, 0] + 0.5 * (w - 1)
        y_ctr = bb[n, 1] + 0.5 * (h - 1)
        a = base_anchors_np.copy()
        a[:, 0] += x_ctr - base_x_ctr
        a[:, 2] += x_ctr - base_x_ctr
        a[:, 1] += y_ctr - base_y_ctr
        a[:, 3] += y_ctr - base_y_ctr
        W, H = szs[n]
        thr = straddle_thresh
        a[:, 0][a[:, 0] < -thr] = thr
        a[:, 1][a[:, 1] < -thr] = thr
        a[:, 2][a[:, 2] >= W + thr] = W + thr
        a[:, 3][a[:, 3] >= H + thr] = H + thr
        out.append(a)
    return np.stack(out, axis=0)                               # (N, A, 4)


# ------------------------------------ demo ---------------------------------------
if __name__ == "__main__":
    # module defaults: sizes=(128, 256, 512), aspect_ratios=(0.5, 1, 2), stride=16
    sizes = (128, 256, 512)
    aspect_ratios = (0.5, 1.0, 2.0)
    anchor_stride = 16
    base_anchors_np, base_x_ctr, base_y_ctr = generate_anchors_np(
        anchor_stride, sizes, aspect_ratios)                    # (9, 4), 7.5, 7.5
    A = base_anchors_np.shape[0]

    # targets: 2 images, one bbox each (matches the reference forward's indexing)
    key = jax.random.PRNGKey(0)
    num_images = 2
    k1, k2 = jax.random.split(key)
    xy1 = jax.random.uniform(k1, (num_images, 2), minval=0.0, maxval=32.0)
    wh = jax.random.uniform(k2, (num_images, 2), minval=8.0, maxval=64.0)
    bboxes = jnp.concatenate([xy1, xy1 + wh], axis=-1).astype(jnp.float32)    # (2, 4)
    image_sizes = jnp.array([[64.0, 48.0], [96.0, 80.0]], dtype=jnp.float32)  # (W, H)

    # TODO(synk): the 'labels' field is Python-list replication (len(roi)*[label])
    # and BoxList construction -- pure host bookkeeping, no tensor compute, so it
    # is not kernelized.

    ok = True
    for thr in (0.0, 0.5):   # exercise both visibility branches
        out_planes = anchor_generator_forward(
            bboxes, image_sizes, base_anchors_np,
            float(base_x_ctr), float(base_y_ctr), straddle_thresh=thr)
        out_planes = jax.block_until_ready(out_planes)

        out_boxes = planes_to_boxes(out_planes, num_images, A)   # host re-layout
        ref = _reference_np(bboxes, image_sizes, base_anchors_np,
                            float(base_x_ctr), float(base_y_ctr), thr)

        assert out_boxes.shape == (num_images, A, 4)
        err = np.abs(out_boxes.astype(np.float64) - ref).max()
        if not np.allclose(out_boxes.astype(np.float64), ref, atol=1e-3):
            ok = False
            print("mismatch at straddle_thresh=%g: max abs err %g" % (thr, err))

    if ok:
        print("KERNEL_OK")
</pallas_src>

<mosaic_0001>
module attributes {stable_mosaic.version = 11 : i64} {
  func.func @kernel(%arg0: i32, %arg1: memref<8x128xf32, #tpu.memory_space<vmem>>, %arg2: memref<40x1xf32, #tpu.memory_space<vmem>>, %arg3: memref<40x128xf32, #tpu.memory_space<vmem>>) attributes {dimension_semantics = [#tpu.dimension_semantics<parallel>], iteration_bounds = array<i64: 1>, scalar_prefetch = 0 : i64, scratch_operands = 0 : i64, tpu.core_type = #tpu.core_type<tc>, window_params = [{transform_indices = @transform_0, window_bounds = array<i64: 8, 128>}, {pipeline_mode = #tpu.pipeline_mode<synchronous>, transform_indices = @transform_1, window_bounds = array<i64: 40, 1>}, {transform_indices = @transform_2, window_bounds = array<i64: 40, 128>}]} {
    %c0 = arith.constant 0 : index
    %c0_0 = arith.constant 0 : index
    %0 = vector.load %arg1[%c0, %c0_0] : memref<8x128xf32, #tpu.memory_space<vmem>>, vector<1x128xf32>
    %c1 = arith.constant 1 : index
    %c0_1 = arith.constant 0 : index
    %1 = vector.load %arg1[%c1, %c0_1] : memref<8x128xf32, #tpu.memory_space<vmem>>, vector<1x128xf32>
    %c2 = arith.constant 2 : index
    %c0_2 = arith.constant 0 : index
    %2 = vector.load %arg1[%c2, %c0_2] : memref<8x128xf32, #tpu.memory_space<vmem>>, vector<1x128xf32>
    %c3 = arith.constant 3 : index
    %c0_3 = arith.constant 0 : index
    %3 = vector.load %arg1[%c3, %c0_3] : memref<8x128xf32, #tpu.memory_space<vmem>>, vector<1x128xf32>
    %c4 = arith.constant 4 : index
    %c0_4 = arith.constant 0 : index
    %4 = vector.load %arg1[%c4, %c0_4] : memref<8x128xf32, #tpu.memory_space<vmem>>, vector<1x128xf32>
    %c5 = arith.constant 5 : index
    %c0_5 = arith.constant 0 : index
    %5 = vector.load %arg1[%c5, %c0_5] : memref<8x128xf32, #tpu.memory_space<vmem>>, vector<1x128xf32>
    %6 = arith.subf %2, %0 : vector<1x128xf32>
    %cst = arith.constant 1.000000e+00 : f32
    %7 = vector.broadcast %cst : f32 to vector<1x128xf32>
    %8 = arith.addf %6, %7 : vector<1x128xf32>
    %9 = arith.subf %3, %1 : vector<1x128xf32>
    %cst_6 = arith.constant 1.000000e+00 : f32
    %10 = vector.broadcast %cst_6 : f32 to vector<1x128xf32>
    %11 = arith.addf %9, %10 : vector<1x128xf32>
    %cst_7 = arith.constant 1.000000e+00 : f32
    %12 = vector.broadcast %cst_7 : f32 to vector<1x128xf32>
    %13 = arith.subf %8, %12 : vector<1x128xf32>
    %cst_8 = arith.constant 5.000000e-01 : f32
    %14 = vector.broadcast %cst_8 : f32 to vector<1x128xf32>
    %15 = arith.mulf %14, %13 : vector<1x128xf32>
    %16 = arith.addf %0, %15 : vector<1x128xf32>
    %cst_9 = arith.constant 7.500000e+00 : f32
    %17 = vector.broadcast %cst_9 : f32 to vector<1x128xf32>
    %18 = arith.subf %16, %17 : vector<1x128xf32>
    %cst_10 = arith.constant 1.000000e+00 : f32
    %19 = vector.broadcast %cst_10 : f32 to vector<1x128xf32>
    %20 = arith.subf %11, %19 : vector<1x128xf32>
    %cst_11 = arith.constant 5.000000e-01 : f32
    %21 = vector.broadcast %cst_11 : f32 to vector<1x128xf32>
    %22 = arith.mulf %21, %20 : vector<1x128xf32>
    %23 = arith.addf %1, %22 : vector<1x128xf32>
    %cst_12 = arith.constant 7.500000e+00 : f32
    %24 = vector.broadcast %cst_12 : f32 to vector<1x128xf32>
    %25 = arith.subf %23, %24 : vector<1x128xf32>
    %26 = tpu.iota {dimensions = array<i32: 0>} : vector<40x128xi32>
    %c1_i32 = arith.constant 1 : i32
    %27 = vector.broadcast %c1_i32 : i32 to vector<40x128xi32>
    %28 = arith.andi %26, %27 : vector<40x128xi32>
    %c0_i32 = arith.constant 0 : i32
    %29 = vector.broadcast %c0_i32 : i32 to vector<40x128xi32>
    %30 = arith.cmpi eq, %28, %29 : vector<40x128xi32>
    %c2_i32 = arith.constant 2 : i32
    %31 = vector.broadcast %c2_i32 : i32 to vector<40x128xi32>
    %32 = arith.andi %26, %31 : vector<40x128xi32>
    %c0_i32_13 = arith.constant 0 : i32
    %33 = vector.broadcast %c0_i32_13 : i32 to vector<40x128xi32>
    %34 = arith.cmpi eq, %32, %33 : vector<40x128xi32>
    %35 = vector.shape_cast %18 : vector<1x128xf32> to vector<1x128xf32>
    %36 = vector.broadcast %35 : vector<1x128xf32> to vector<40x128xf32>
    %37 = vector.shape_cast %25 : vector<1x128xf32> to vector<1x128xf32>
    %38 = vector.broadcast %37 : vector<1x128xf32> to vector<40x128xf32>
    %39 = arith.select %30, %36, %38 : vector<40x128xi1>, vector<40x128xf32>
    %c0_14 = arith.constant 0 : index
    %c0_15 = arith.constant 0 : index
    %40 = vector.load %arg2[%c0_14, %c0_15] : memref<40x1xf32, #tpu.memory_space<vmem>>, vector<40x1xf32>
    %41 = vector.broadcast %40 : vector<40x1xf32> to vector<40x128xf32>
    %42 = arith.addf %41, %39 : vector<40x128xf32>
    %43 = vector.shape_cast %4 : vector<1x128xf32> to vector<1x128xf32>
    %44 = vector.broadcast %43 : vector<1x128xf32> to vector<40x128xf32>
    %45 = vector.shape_cast %5 : vector<1x128xf32> to vector<1x128xf32>
    %46 = vector.broadcast %45 : vector<1x128xf32> to vector<40x128xf32>
    %47 = arith.select %30, %44, %46 : vector<40x128xi1>, vector<40x128xf32>
    %cst_16 = arith.constant 0.000000e+00 : f32
    %48 = vector.broadcast %cst_16 : f32 to vector<40x128xf32>
    %49 = arith.maximumf %42, %48 : vector<40x128xf32>
    %50 = arith.minimumf %42, %47 : vector<40x128xf32>
    %51 = arith.select %34, %49, %50 : vector<40x128xi1>, vector<40x128xf32>
    %c0_17 = arith.constant 0 : index
    %c0_18 = arith.constant 0 : index
    %52 = vector.load %arg3[%c0_17, %c0_18] : memref<40x128xf32, #tpu.memory_space<vmem>>, vector<40x128xf32>
    tpu.vector_store %arg3[%c0_17, %c0_18], %51 {strides = array<i32>} : memref<40x128xf32, #tpu.memory_space<vmem>>, vector<40x128xf32>,
    return
  }
  func.func @transform_0(%arg0: i32) -> (i32, i32) {
    %c0_i32 = arith.constant 0 : i32
    %c0_i32_0 = arith.constant 0 : i32
    return %c0_i32, %arg0 : i32, i32
  }
  func.func @transform_1(%arg0: i32) -> (i32, i32) {
    %c0_i32 = arith.constant 0 : i32
    %c0_i32_0 = arith.constant 0 : i32
    %c0_i32_1 = arith.constant 0 : i32
    return %c0_i32, %c0_i32_0 : i32, i32
  }
  func.func @transform_2(%arg0: i32) -> (i32, i32) {
    %c0_i32 = arith.constant 0 : i32
    %c0_i32_0 = arith.constant 0 : i32
    return %c0_i32, %arg0 : i32, i32
  }
}

</mosaic_0001>

<bundles_post_ra>
// kernel: tpu_custom_call.1
= control target key start
LH: loop header
LB: loop body
LE: loop exit
PB: predicated region body
PF: predicated region fallthrough
CT: control target
= control target key end

     0   :  { %v187_v2 = vmov 0   ;;  %s294_s0 = inlined_call_operand.vmem [shape: f32[8,128], index: 0, kind: input, shape index: {}]   ;;  %s295_s1 = inlined_call_operand.vmem [shape: f32[40,1], index: 1, kind: input, shape index: {}]   ;;  %s296_s2 = inlined_call_operand.hbm [shape: f32[40,128], index: 2, kind: output, shape index: {}]  }
   0x1   :  { %v71_v0 = vld [vmem:[%s295_s1 + $0x10] sm:$0xff]  ;;  %v69_v1 = vld [vmem:[%s295_s1] sm:$0xff]  ;;  %164 = vset.pattern.permute.xlu1 %v187_v2  ;;  %163 = vset.pattern.permute.xlu0 %v187_v2  ;;  %v72_v3 = vld [vmem:[%s295_s1 + $0x18] sm:$0xff] }
   0x2   :  { %86 = vperm.xlu1 %164, %v71_v0   ;;  %76 = vperm.xlu0 %163, %v69_v1   ;;  %v70_v4 = vld [vmem:[%s295_s1 + $0x8] sm:$0xff] }
   0x3   :  { %7 = vsyncpa [#allocation3], 0  ;;  %v73_v5 = vld [vmem:[%s295_s1 + $0x20] sm:$0xff]  ;;  %v30_v16 = vlaneseq }
   0x4   :  { %v12_v6 = vld [vmem:[%s294_s0] sm:$0x1]  ;;  %v13_v7 = vld [vmem:[%s294_s0 + $0x1] sm:$0x1]  ;;  %v14_v8 = vld [vmem:[%s294_s0 + $0x2] sm:$0x1] }
   0x5   :  { %v15_v9 = vld [vmem:[%s294_s0 + $0x3] sm:$0x1]  ;;  %v18_v10 = vsub.f32 %v14_v8, %v12_v6  ;;  %v31_v19 = vshrl.u32 %v30_v16, 7  ;;  %v157_v38 = vld [vmem:[%s294_s0 + $0x4] ss:$0 sm:$0xff] }
   0x6   :  { %91 = vperm.xlu1 %164, %v72_v3   ;;  %81 = vperm.xlu0 %163, %v70_v4   ;;  %v20_v11 = vsub.f32 %v15_v9, %v13_v7  ;;  %v158_v39 = vld [vmem:[%s294_s0 + $0x5] ss:$0 sm:$0xff]  ;;  %s188_s0 = smov [#allocation2]  }
   0x7   :  { %v19_v12 = vadd.f32 1.0, %v18_v10  ;;  %v33_v22 = vadd.s32 16, %v31_v19  ;;  %v58_v25 = vsub.s32 0, %v31_v19  ;;  %v36_v27 = vand.u32 1, %v31_v19  ;;  %s142_s30 = sshll.u32 %s188_s0, 4  ;;  %s143_s30 = int_to_ptr.vmem [resolvable:$true] %s142_s30 }
   0x8   :  { %v21_v13 = vadd.f32 1.0, %v20_v11  ;;  %v34_v28 = vadd.s32 24, %v31_v19  ;;  %v32_v29 = vadd.s32 8, %v31_v19  ;;  %v35_v32 = vadd.s32 32, %v31_v19  ;;  %s165_s3 = scalar_lea.vmem %s143_s30, 640  ;;  %p170_p1 = scmp.lt.s32.totalorder %s143_s30, %s143_s30 }
   0x9   :  { %v153_v14 = vadd.f32 -1.0, %v19_v12  ;;  %v38_v26 = vand.u32 1, %v33_v22  ;;  %vm237_vm1 = vcmp.eq.s32.totalorder %v36_v27, 0  ;;  %v46_v37 = vand.u32 2, %v31_v19  ;;  %p166_p0 = scmp.ne.s32.totalorder %s143_s30, %s165_s3  ;;  %p171_p2 = scmp.lt.s32.totalorder %s165_s3, %s165_s3 }
   0xa   :  { %96 = vperm.xlu0 %163, %v73_v5   ;;  %v155_v15 = vadd.f32 -1.0, %v21_v13  ;;  %v39_v35 = vand.u32 1, %v34_v28  ;;  %v37_v36 = vand.u32 1, %v32_v29  ;;  %v48_v40 = vand.u32 2, %v33_v22 }
   0xb   :  { %v23_v17 = vmul.f32 0.5, %v153_v14  ;;  %vm233_vm0 = vcmp.eq.s32.totalorder %v38_v26, 0  ;;  %v40_v43 = vand.u32 1, %v35_v32  ;;  %vm261_vm4 = vcmp.eq.s32.totalorder %v46_v37, 0  ;;  %p172_p3 = por %p171_p2, %p170_p1 }
   0xc   :  { %v27_v18 = vmul.f32 0.5, %v155_v15  ;;  %vm251_vm2 = vcmp.eq.s32.totalorder %v39_v35, 0  ;;  %vm255_vm3 = vcmp.eq.s32.totalorder %v37_v36, 0  ;;  %v114_v47 = vsel %vm233_vm0, %v157_v38, %v158_v39 }
   0xd   :  { %v24_v20 = vadd.f32 %v23_v17, %v12_v6  ;;  %v112_v50 = vsel %vm237_vm1, %v157_v38, %v158_v39  ;;  %vm267_vm5 = vcmp.eq.s32.totalorder %v48_v40, 0  ;;  %v49_v54 = vand.u32 2, %v34_v28  ;;  %p173_p4 = pnand %p172_p3, %p166_p0 }
   0xe   :  { %v28_v21 = vadd.f32 %v27_v18, %v13_v7  ;;  %v47_v56 = vand.u32 2, %v32_v29  ;;  %vm275_vm6 = vcmp.eq.s32.totalorder %v40_v43, 0  ;;  %v115_v0 = vsel %vm251_vm2, %v157_v38, %v158_v39 }
   0xf   :  { %v154_v23 = vadd.f32 -7.5, %v24_v20  ;;  %v113_v2 = vsel %vm255_vm3, %v157_v38, %v158_v39  ;;  %vm54_vm7 = vcmp.eq.s32.totalorder %v49_v54, 0  ;;  %v50_v7 = vand.u32 2, %v35_v32 }
  0x10   :  { %v156_v24 = vadd.f32 -7.5, %v28_v21  ;;  %vm52_vm8 = vcmp.eq.s32.totalorder %v47_v56, 0  ;;  %v116_v14 = vsel %vm275_vm6, %v157_v38, %v158_v39 }
  0x11   :  { %v59_v30 = vrot.slane %v154_v23, %v58_v25  ;;  %vm55_vm9 = vcmp.eq.s32.totalorder %v50_v7, 0 }
  0x12   :  { %v63_v31 = vrot.slane %v156_v24, %v58_v25 }
  0x14   :  { %v66_v41 = vsel %vm233_vm0, %v59_v30, %v63_v31  ;;  %v64_v42 = vsel %vm237_vm1, %v59_v30, %v63_v31  ;;  %v67_v55 = vsel %vm251_vm2, %v59_v30, %v63_v31  ;;  %v65_v57 = vsel %vm255_vm3, %v59_v30, %v63_v31 }
  0x15   :  { %v68_v8 = vsel %vm275_vm6, %v59_v30, %v63_v31 }
  0x7d   :  { %v87_v46 = vpop.permute.xlu1 %86  ;;  %v77_v48 = vpop.permute.xlu0 %76 }
  0x7e   :  { %v101_v52 = vadd.f32 %v87_v46, %v66_v41  ;;  %v99_v53 = vadd.f32 %v77_v48, %v64_v42 }
  0x80   :  { %v119_v59 = vmax.f32 %v101_v52, 0.0  ;;  %v124_v60 = vmin.f32 %v101_v52, %v114_v47  ;;  %v117_v61 = vmax.f32 %v99_v53, 0.0  ;;  %v122_v62 = vmin.f32 %v99_v53, %v112_v50 }
  0x81   :  { %v92_v63 = vpop.permute.xlu1 %91  ;;  %v82_v1 = vpop.permute.xlu0 %81 }
  0x82   :  { %v129_v3 = vsel %vm267_vm5, %v119_v59, %v124_v60  ;;  %v127_v4 = vsel %vm261_vm4, %v117_v61, %v122_v62  ;;  %v102_v5 = vadd.f32 %v92_v63, %v67_v55  ;;  %v100_v6 = vadd.f32 %v82_v1, %v65_v57 }
  0x83   :  { %134 = vst [vmem:[#allocation2 + $0x10] sm:$0xff] %v129_v3  ;;  %132 = vst [vmem:[#allocation2] sm:$0xff] %v127_v4 }
  0x84   :  { %v120_v9 = vmax.f32 %v102_v5, 0.0  ;;  %v125_v10 = vmin.f32 %v102_v5, %v115_v0  ;;  %v118_v11 = vmax.f32 %v100_v6, 0.0  ;;  %v123_v12 = vmin.f32 %v100_v6, %v113_v2 }
  0x85   :  { %v97_v13 = vpop.permute.xlu0 %96 }
  0x86   :  { %v130_v15 = vsel %vm54_vm7, %v120_v9, %v125_v10  ;;  %v128_v16 = vsel %vm52_vm8, %v118_v11, %v123_v12  ;;  %v103_v17 = vadd.f32 %v97_v13, %v68_v8 }
  0x87   :  { %135 = vst [vmem:[#allocation2 + $0x18] sm:$0xff] %v130_v15  ;;  %133 = vst [vmem:[#allocation2 + $0x8] sm:$0xff] %v128_v16 }
  0x88   :  { %v121_v18 = vmax.f32 %v103_v17, 0.0  ;;  %v126_v19 = vmin.f32 %v103_v17, %v116_v14 }
  0x8a   :  { %v131_v20 = vsel %vm55_vm9, %v121_v18, %v126_v19 }
  0x8b   :  { %136 = vst [vmem:[#allocation2 + $0x20] sm:$0xff] %v131_v20 }
  0x8c   :  { %176 = shalt.err (!%p173_p4)
}
  0x8d   :  { %s189_s4 = smov 128   ;;  %s190_s5 = smov 8  }
  0x8e   :  { %148 = dma.vmem_to_hbm [thread:$0]  %s143_s30, 640, %s296_s2, [#allocation3], %s189_s4, %s189_s4, %s190_s5  }
  0x8f   :  { %185 = dma.done.wait [#allocation3], 640  }
  0x90   :  { %186 = vsyncadd [#allocation3], 4294966656 }
  0x91   :  { %152 = vsyncpa [#allocation3], 1 }

</bundles_post_ra>
